<compile_context>
chip_gen: v7x
topology: tpu7x:2x2x1
jax: 0.10.0
libtpu: 0.0.40
codegen_flags: <defaults>
</compile_context>

<pallas_src>
import math

import jax
import jax.numpy as jnp
from jax.experimental import pallas as pl
from jax.experimental.pallas import tpu as pltpu


def _round_up(n, m):
    return ((n + m - 1) // m) * m


# ----------------------------------------------------------------------------
# Pallas kernel.
# Grid = (row_tiles, k_tiles); K (reduction over A_hat columns) is innermost.
# Scratch: ax_acc (tm, F_pad) f32 partial A_hat@x; g_acc (G_pad, H_pad) f32
# pooled graph embeddings carried across row tiles.
# ----------------------------------------------------------------------------
def gaussian_encoder_kernel(a_ref, x_ref, w1_ref, b1_ref, p_ref, w2_ref, b2_ref,
                            out_ref, ax_acc, g_acc):
    r = pl.program_id(0)
    k = pl.program_id(1)
    nr = pl.num_programs(0)
    nk = pl.num_programs(1)

    @pl.when((r == 0) & (k == 0))
    def _():
        g_acc[...] = jnp.zeros_like(g_acc)

    @pl.when(k == 0)
    def _():
        ax_acc[...] = jnp.zeros_like(ax_acc)

    # Partial message passing: (tm, tk) bf16 @ (tk, F_pad) bf16 -> f32 acc.
    ax_acc[...] += jnp.dot(a_ref[...], x_ref[...],
                           preferred_element_type=jnp.float32)

    @pl.when(k == nk - 1)
    def _():
        # Feature transform + bias + ReLU (bias add & ReLU in f32).
        h = jnp.dot(ax_acc[...].astype(jnp.bfloat16), w1_ref[...],
                    preferred_element_type=jnp.float32) + b1_ref[...]
        h = jnp.maximum(h, 0.0)
        # Mean pooling for this row tile: (G_pad, tm) @ (tm, H_pad).
        g_acc[...] += jnp.dot(p_ref[...], h.astype(jnp.bfloat16),
                              preferred_element_type=jnp.float32)

    @pl.when((r == nr - 1) & (k == nk - 1))
    def _():
        # Head producing the fused [mean | log_std] slab, lane-dense (128).
        out_ref[...] = (jnp.dot(g_acc[...].astype(jnp.bfloat16), w2_ref[...],
                                preferred_element_type=jnp.float32)
                        + b2_ref[...])


# ----------------------------------------------------------------------------
# Wrapper: build A_hat / P, pad to MXU-friendly shapes, run the kernel,
# split mean / scale outside the kernel (lane-dense output slab).
# ----------------------------------------------------------------------------
def gaussian_encoder_forward(x, edge_index, batch, w1, b1, w2, b2,
                             latent_dim, n_graphs, *, tm=256, tk=512):
    n_nodes, n_feat = x.shape
    hidden = w1.shape[1]
    out_dim = 2 * latent_dim

    a_hat = build_adjacency(edge_index, n_nodes)
    pool = build_pool_matrix(batch, n_graphs)

    f_pad = _round_up(n_feat, 128)
    h_pad = _round_up(hidden, 128)
    o_pad = _round_up(out_dim, 128)
    g_pad = _round_up(n_graphs, 8)
    n_pad = _round_up(n_nodes, (tm * tk) // math.gcd(tm, tk))

    # Zero-padding is exact: padded nodes have zero A rows / zero P columns,
    # padded feature/hidden/output columns carry zero weights & biases.
    a_p = jnp.zeros((n_pad, n_pad), jnp.float32).at[:n_nodes, :n_nodes] \
        .set(a_hat).astype(jnp.bfloat16)
    x_p = jnp.zeros((n_pad, f_pad), jnp.float32).at[:n_nodes, :n_feat] \
        .set(x).astype(jnp.bfloat16)
    w1_p = jnp.zeros((f_pad, h_pad), jnp.float32).at[:n_feat, :hidden] \
        .set(w1).astype(jnp.bfloat16)
    b1_p = jnp.zeros((1, h_pad), jnp.float32).at[:, :hidden].set(b1)
    p_p = jnp.zeros((g_pad, n_pad), jnp.float32).at[:n_graphs, :n_nodes] \
        .set(pool).astype(jnp.bfloat16)
    w2_p = jnp.zeros((h_pad, o_pad), jnp.float32).at[:hidden, :out_dim] \
        .set(w2).astype(jnp.bfloat16)
    b2_p = jnp.zeros((1, o_pad), jnp.float32).at[:, :out_dim].set(b2)

    n_row_tiles = n_pad // tm
    n_k_tiles = n_pad // tk

    cost = pl.CostEstimate(
        flops=2 * (n_pad * n_pad * f_pad + n_pad * f_pad * h_pad
                   + g_pad * n_pad * h_pad + g_pad * h_pad * o_pad),
        transcendentals=0,
        bytes_accessed=2 * (n_pad * n_pad + n_pad * f_pad + f_pad * h_pad
                            + g_pad * n_pad + h_pad * o_pad)
                       + 4 * (h_pad + o_pad + g_pad * o_pad),
    )

    out_pad = pl.pallas_call(
        gaussian_encoder_kernel,
        out_shape=jax.ShapeDtypeStruct((g_pad, o_pad), jnp.float32),
        grid_spec=pltpu.PrefetchScalarGridSpec(
            num_scalar_prefetch=0,
            grid=(n_row_tiles, n_k_tiles),
            in_specs=[
                pl.BlockSpec((tm, tk), lambda r, k: (r, k)),         # A_hat tile
                pl.BlockSpec((tk, f_pad), lambda r, k: (k, 0)),      # x tile
                pl.BlockSpec((f_pad, h_pad), lambda r, k: (0, 0)),   # W1 (resident)
                pl.BlockSpec((1, h_pad), lambda r, k: (0, 0)),       # b1 (resident)
                pl.BlockSpec((g_pad, tm), lambda r, k: (0, r)),      # P row-tile
                pl.BlockSpec((h_pad, o_pad), lambda r, k: (0, 0)),   # W2 (resident)
                pl.BlockSpec((1, o_pad), lambda r, k: (0, 0)),       # b2 (resident)
            ],
            out_specs=pl.BlockSpec((g_pad, o_pad), lambda r, k: (0, 0)),
            scratch_shapes=[
                pltpu.VMEM((tm, f_pad), jnp.float32),     # A_hat@x accumulator
                pltpu.VMEM((g_pad, h_pad), jnp.float32),  # pooled-graph accumulator
            ],
        ),
        # Row axis carries the pooled accumulator across tiles -> "arbitrary".
        compiler_params=pltpu.CompilerParams(
            dimension_semantics=("arbitrary", "arbitrary")),
        cost_estimate=cost,
    )(a_p, x_p, w1_p, b1_p, p_p, w2_p, b2_p)

    # Chunk + exp done in the wrapper so the kernel's output stays lane-dense.
    out = out_pad[:n_graphs, :out_dim]
    mean = out[:, :latent_dim]
    scale = jnp.exp(out[:, latent_dim:]) + 1e-7
    # TODO(synk): td.Independent(td.Normal(...)) has no kernel equivalent; we
    # return its parameters (mean, scale).
    return mean, scale


# ----------------------------------------------------------------------------
# Plain-JAX glue: normalized adjacency and mean-pooling matrix.
# ----------------------------------------------------------------------------
def build_adjacency(edge_index, n_nodes):
    src, dst = edge_index[0], edge_index[1]
    a = jnp.zeros((n_nodes, n_nodes), jnp.float32)
    a = a.at[src, dst].set(1.0)
    a = jnp.maximum(a, a.T)                       # symmetrize
    a = a + jnp.eye(n_nodes, dtype=jnp.float32)   # self loops
    deg = jnp.sum(a, axis=1)
    d_inv_sqrt = 1.0 / jnp.sqrt(deg)
    return a * d_inv_sqrt[:, None] * d_inv_sqrt[None, :]


def build_pool_matrix(batch, n_graphs):
    one_hot = (batch[None, :] == jnp.arange(n_graphs)[:, None]).astype(jnp.float32)
    counts = jnp.maximum(jnp.sum(one_hot, axis=1, keepdims=True), 1.0)
    return one_hot / counts   # (G, N) mean-pooling


# ----------------------------------------------------------------------------
# Pure-JAX f32 reference.
# ----------------------------------------------------------------------------
def reference(a_hat, x, w1, b1, pool, w2, b2, latent_dim):
    h = jnp.maximum(a_hat @ x @ w1 + b1, 0.0)
    out = pool @ h @ w2 + b2
    mean, log_std = out[:, :latent_dim], out[:, latent_dim:]
    return mean, jnp.exp(log_std) + 1e-7


if __name__ == "__main__":
    key = jax.random.PRNGKey(0)

    N, F, Hdim, L, G = 256, 8, 32, 8, 2   # nodes, feat, hidden, latent, graphs
    npg = N // G                          # nodes per graph

    k_x, k_w1, k_b1, k_w2, k_b2 = jax.random.split(key, 5)
    x = jax.random.normal(k_x, (N, F), jnp.float32)

    # Deterministic edges: a ring within each graph.
    src, dst = [], []
    for g in range(G):
        base = g * npg
        for i in range(npg):
            src.append(base + i)
            dst.append(base + (i + 1) % npg)
    edge_index = jnp.array([src, dst], dtype=jnp.int32)            # (2, N)
    batch = jnp.array(sum(([g] * npg for g in range(G)), []), jnp.int32)  # (N,)

    # Deterministic synthetic parameters (no checkpoint loading).
    w1 = 0.1 * jax.random.normal(k_w1, (F, Hdim), jnp.float32)
    b1 = 0.01 * jax.random.normal(k_b1, (1, Hdim), jnp.float32)
    w2 = 0.1 * jax.random.normal(k_w2, (Hdim, 2 * L), jnp.float32)
    b2 = 0.01 * jax.random.normal(k_b2, (1, 2 * L), jnp.float32)

    # tm=tk=128 at this size gives a 2x2 grid, exercising both accumulators.
    mean, scale = gaussian_encoder_forward(x, edge_index, batch, w1, b1, w2, b2,
                                           L, G, tm=128, tk=128)
    jax.block_until_ready((mean, scale))

    a_hat = build_adjacency(edge_index, N)
    pool = build_pool_matrix(batch, G)
    ref_mean, ref_scale = reference(a_hat, x, w1, b1, pool, w2, b2, L)

    assert mean.shape == (G, L) and scale.shape == (G, L)
    # bf16 MXU operands vs. f32 reference -> loose tolerance.
    assert jnp.allclose(mean, ref_mean, atol=2e-2, rtol=2e-2), (mean, ref_mean)
    assert jnp.allclose(scale, ref_scale, atol=2e-2, rtol=2e-2), (scale, ref_scale)
    assert bool(jnp.all(scale > 0.0))

    print("KERNEL_OK")
</pallas_src>

<mosaic_0001>
module attributes {stable_mosaic.version = 11 : i64} {
  func.func @gaussian_encoder_kernel(%arg0: i32, %arg1: i32, %arg2: memref<128x128xbf16, #tpu.memory_space<vmem>>, %arg3: memref<128x128xbf16, #tpu.memory_space<vmem>>, %arg4: memref<128x128xbf16, #tpu.memory_space<vmem>>, %arg5: memref<1x128xf32, #tpu.memory_space<vmem>>, %arg6: memref<8x128xbf16, #tpu.memory_space<vmem>>, %arg7: memref<128x128xbf16, #tpu.memory_space<vmem>>, %arg8: memref<1x128xf32, #tpu.memory_space<vmem>>, %arg9: memref<8x128xf32, #tpu.memory_space<vmem>>, %arg10: memref<128x128xf32, #tpu.memory_space<vmem>>, %arg11: memref<8x128xf32, #tpu.memory_space<vmem>>) attributes {dimension_semantics = [#tpu.dimension_semantics<arbitrary>, #tpu.dimension_semantics<arbitrary>], iteration_bounds = array<i64: 2, 2>, scalar_prefetch = 0 : i64, scratch_operands = 2 : i64, tpu.core_type = #tpu.core_type<tc>, window_params = [{transform_indices = @transform_0, window_bounds = array<i64: 128, 128>}, {transform_indices = @transform_1, window_bounds = array<i64: 128, 128>}, {pipeline_mode = #tpu.pipeline_mode<synchronous>, transform_indices = @transform_2, window_bounds = array<i64: 128, 128>}, {pipeline_mode = #tpu.pipeline_mode<synchronous>, transform_indices = @transform_3, window_bounds = array<i64: 1, 128>}, {transform_indices = @transform_4, window_bounds = array<i64: 8, 128>}, {pipeline_mode = #tpu.pipeline_mode<synchronous>, transform_indices = @transform_5, window_bounds = array<i64: 128, 128>}, {pipeline_mode = #tpu.pipeline_mode<synchronous>, transform_indices = @transform_6, window_bounds = array<i64: 1, 128>}, {pipeline_mode = #tpu.pipeline_mode<synchronous>, transform_indices = @transform_7, window_bounds = array<i64: 8, 128>}]} {
    %c0_i32 = arith.constant 0 : i32
    %0 = arith.cmpi eq, %arg0, %c0_i32 : i32
    %c0_i32_0 = arith.constant 0 : i32
    %1 = arith.cmpi eq, %arg1, %c0_i32_0 : i32
    %2 = arith.andi %0, %1 : i1
    %3 = arith.extui %2 : i1 to i32
    %c0_i32_1 = arith.constant 0 : i32
    %4 = arith.cmpi ne, %3, %c0_i32_1 : i32
    scf.if %4 {
      %cst_15 = arith.constant 0.000000e+00 : f32
      %22 = vector.broadcast %cst_15 : f32 to vector<8x128xf32>
      %c0_16 = arith.constant 0 : index
      %c0_17 = arith.constant 0 : index
      %23 = vector.load %arg11[%c0_16, %c0_17] : memref<8x128xf32, #tpu.memory_space<vmem>>, vector<8x128xf32>
      tpu.vector_store %arg11[%c0_16, %c0_17], %22 {strides = array<i32>} : memref<8x128xf32, #tpu.memory_space<vmem>>, vector<8x128xf32>,
    } else {
    }
    %c0_i32_2 = arith.constant 0 : i32
    %5 = arith.cmpi eq, %arg1, %c0_i32_2 : i32
    %6 = arith.extui %5 : i1 to i32
    %c0_i32_3 = arith.constant 0 : i32
    %7 = arith.cmpi ne, %6, %c0_i32_3 : i32
    scf.if %7 {
      %cst_15 = arith.constant 0.000000e+00 : f32
      %22 = vector.broadcast %cst_15 : f32 to vector<128x128xf32>
      %c0_16 = arith.constant 0 : index
      %c0_17 = arith.constant 0 : index
      %23 = vector.load %arg10[%c0_16, %c0_17] : memref<128x128xf32, #tpu.memory_space<vmem>>, vector<128x128xf32>
      tpu.vector_store %arg10[%c0_16, %c0_17], %22 {strides = array<i32>} : memref<128x128xf32, #tpu.memory_space<vmem>>, vector<128x128xf32>,
    } else {
    }
    %c0 = arith.constant 0 : index
    %c0_4 = arith.constant 0 : index
    %8 = vector.load %arg10[%c0, %c0_4] : memref<128x128xf32, #tpu.memory_space<vmem>>, vector<128x128xf32>
    %c0_5 = arith.constant 0 : index
    %c0_6 = arith.constant 0 : index
    %9 = vector.load %arg2[%c0_5, %c0_6] : memref<128x128xbf16, #tpu.memory_space<vmem>>, vector<128x128xbf16>
    %c0_7 = arith.constant 0 : index
    %c0_8 = arith.constant 0 : index
    %10 = vector.load %arg3[%c0_7, %c0_8] : memref<128x128xbf16, #tpu.memory_space<vmem>>, vector<128x128xbf16>
    %cst = arith.constant dense<0.000000e+00> : vector<128x128xf32>
    %11 = tpu.matmul %9, %10, %cst {dimension_numbers = #tpu.dot_dimension_numbers<[1], [0], [0], [1], [0, 0, 1, 1], [], []>} : vector<128x128xbf16>, vector<128x128xbf16>, vector<128x128xf32> -> vector<128x128xf32>
    %12 = arith.addf %8, %11 : vector<128x128xf32>
    %c0_9 = arith.constant 0 : index
    %c0_10 = arith.constant 0 : index
    %13 = vector.load %arg10[%c0_9, %c0_10] : memref<128x128xf32, #tpu.memory_space<vmem>>, vector<128x128xf32>
    tpu.vector_store %arg10[%c0_9, %c0_10], %12 {strides = array<i32>} : memref<128x128xf32, #tpu.memory_space<vmem>>, vector<128x128xf32>,
    %c1_i32 = arith.constant 1 : i32
    %14 = arith.cmpi eq, %arg1, %c1_i32 : i32
    %15 = arith.extui %14 : i1 to i32
    %c0_i32_11 = arith.constant 0 : i32
    %16 = arith.cmpi ne, %15, %c0_i32_11 : i32
    scf.if %16 {
      %c0_15 = arith.constant 0 : index
      %c0_16 = arith.constant 0 : index
      %22 = vector.load %arg10[%c0_15, %c0_16] : memref<128x128xf32, #tpu.memory_space<vmem>>, vector<128x128xf32>
      %23 = arith.truncf %22 : vector<128x128xf32> to vector<128x128xbf16>
      %c0_17 = arith.constant 0 : index
      %c0_18 = arith.constant 0 : index
      %24 = vector.load %arg4[%c0_17, %c0_18] : memref<128x128xbf16, #tpu.memory_space<vmem>>, vector<128x128xbf16>
      %cst_19 = arith.constant dense<0.000000e+00> : vector<128x128xf32>
      %25 = tpu.matmul %23, %24, %cst_19 {dimension_numbers = #tpu.dot_dimension_numbers<[1], [0], [0], [1], [0, 0, 1, 1], [], []>} : vector<128x128xbf16>, vector<128x128xbf16>, vector<128x128xf32> -> vector<128x128xf32>
      %c0_20 = arith.constant 0 : index
      %c0_21 = arith.constant 0 : index
      %26 = vector.load %arg5[%c0_20, %c0_21] : memref<1x128xf32, #tpu.memory_space<vmem>>, vector<1x128xf32>
      %27 = vector.broadcast %26 : vector<1x128xf32> to vector<128x128xf32>
      %28 = arith.addf %25, %27 : vector<128x128xf32>
      %cst_22 = arith.constant 0.000000e+00 : f32
      %29 = vector.broadcast %cst_22 : f32 to vector<128x128xf32>
      %30 = arith.maximumf %28, %29 : vector<128x128xf32>
      %c0_23 = arith.constant 0 : index
      %c0_24 = arith.constant 0 : index
      %31 = vector.load %arg11[%c0_23, %c0_24] : memref<8x128xf32, #tpu.memory_space<vmem>>, vector<8x128xf32>
      %c0_25 = arith.constant 0 : index
      %c0_26 = arith.constant 0 : index
      %32 = vector.load %arg6[%c0_25, %c0_26] : memref<8x128xbf16, #tpu.memory_space<vmem>>, vector<8x128xbf16>
      %33 = arith.truncf %30 : vector<128x128xf32> to vector<128x128xbf16>
      %cst_27 = arith.constant dense<0.000000e+00> : vector<8x128xf32>
      %34 = tpu.matmul %32, %33, %cst_27 {dimension_numbers = #tpu.dot_dimension_numbers<[1], [0], [0], [1], [0, 0, 1, 1], [], []>} : vector<8x128xbf16>, vector<128x128xbf16>, vector<8x128xf32> -> vector<8x128xf32>
      %35 = arith.addf %31, %34 : vector<8x128xf32>
      %c0_28 = arith.constant 0 : index
      %c0_29 = arith.constant 0 : index
      %36 = vector.load %arg11[%c0_28, %c0_29] : memref<8x128xf32, #tpu.memory_space<vmem>>, vector<8x128xf32>
      tpu.vector_store %arg11[%c0_28, %c0_29], %35 {strides = array<i32>} : memref<8x128xf32, #tpu.memory_space<vmem>>, vector<8x128xf32>,
    } else {
    }
    %c1_i32_12 = arith.constant 1 : i32
    %17 = arith.cmpi eq, %arg0, %c1_i32_12 : i32
    %c1_i32_13 = arith.constant 1 : i32
    %18 = arith.cmpi eq, %arg1, %c1_i32_13 : i32
    %19 = arith.andi %17, %18 : i1
    %20 = arith.extui %19 : i1 to i32
    %c0_i32_14 = arith.constant 0 : i32
    %21 = arith.cmpi ne, %20, %c0_i32_14 : i32
    scf.if %21 {
      %c0_15 = arith.constant 0 : index
      %c0_16 = arith.constant 0 : index
      %22 = vector.load %arg11[%c0_15, %c0_16] : memref<8x128xf32, #tpu.memory_space<vmem>>, vector<8x128xf32>
      %23 = arith.truncf %22 : vector<8x128xf32> to vector<8x128xbf16>
      %c0_17 = arith.constant 0 : index
      %c0_18 = arith.constant 0 : index
      %24 = vector.load %arg7[%c0_17, %c0_18] : memref<128x128xbf16, #tpu.memory_space<vmem>>, vector<128x128xbf16>
      %cst_19 = arith.constant dense<0.000000e+00> : vector<8x128xf32>
      %25 = tpu.matmul %23, %24, %cst_19 {dimension_numbers = #tpu.dot_dimension_numbers<[1], [0], [0], [1], [0, 0, 1, 1], [], []>} : vector<8x128xbf16>, vector<128x128xbf16>, vector<8x128xf32> -> vector<8x128xf32>
      %c0_20 = arith.constant 0 : index
      %c0_21 = arith.constant 0 : index
      %26 = vector.load %arg8[%c0_20, %c0_21] : memref<1x128xf32, #tpu.memory_space<vmem>>, vector<1x128xf32>
      %27 = vector.broadcast %26 : vector<1x128xf32> to vector<8x128xf32>
      %28 = arith.addf %25, %27 : vector<8x128xf32>
      %c0_22 = arith.constant 0 : index
      %c0_23 = arith.constant 0 : index
      %29 = vector.load %arg9[%c0_22, %c0_23] : memref<8x128xf32, #tpu.memory_space<vmem>>, vector<8x128xf32>
      tpu.vector_store %arg9[%c0_22, %c0_23], %28 {strides = array<i32>} : memref<8x128xf32, #tpu.memory_space<vmem>>, vector<8x128xf32>,
    } else {
    }
    return
  }
  func.func @transform_0(%arg0: i32, %arg1: i32) -> (i32, i32) {
    %c0_i32 = arith.constant 0 : i32
    return %arg0, %arg1 : i32, i32
  }
  func.func @transform_1(%arg0: i32, %arg1: i32) -> (i32, i32) {
    %c0_i32 = arith.constant 0 : i32
    %c0_i32_0 = arith.constant 0 : i32
    return %arg1, %c0_i32 : i32, i32
  }
  func.func @transform_2(%arg0: i32, %arg1: i32) -> (i32, i32) {
    %c0_i32 = arith.constant 0 : i32
    %c0_i32_0 = arith.constant 0 : i32
    %c0_i32_1 = arith.constant 0 : i32
    return %c0_i32, %c0_i32_0 : i32, i32
  }
  func.func @transform_3(%arg0: i32, %arg1: i32) -> (i32, i32) {
    %c0_i32 = arith.constant 0 : i32
    %c0_i32_0 = arith.constant 0 : i32
    %c0_i32_1 = arith.constant 0 : i32
    return %c0_i32, %c0_i32_0 : i32, i32
  }
  func.func @transform_4(%arg0: i32, %arg1: i32) -> (i32, i32) {
    %c0_i32 = arith.constant 0 : i32
    %c0_i32_0 = arith.constant 0 : i32
    return %c0_i32, %arg0 : i32, i32
  }
  func.func @transform_5(%arg0: i32, %arg1: i32) -> (i32, i32) {
    %c0_i32 = arith.constant 0 : i32
    %c0_i32_0 = arith.constant 0 : i32
    %c0_i32_1 = arith.constant 0 : i32
    return %c0_i32, %c0_i32_0 : i32, i32
  }
  func.func @transform_6(%arg0: i32, %arg1: i32) -> (i32, i32) {
    %c0_i32 = arith.constant 0 : i32
    %c0_i32_0 = arith.constant 0 : i32
    %c0_i32_1 = arith.constant 0 : i32
    return %c0_i32, %c0_i32_0 : i32, i32
  }
  func.func @transform_7(%arg0: i32, %arg1: i32) -> (i32, i32) {
    %c0_i32 = arith.constant 0 : i32
    %c0_i32_0 = arith.constant 0 : i32
    %c0_i32_1 = arith.constant 0 : i32
    return %c0_i32, %c0_i32_0 : i32, i32
  }
}

</mosaic_0001>

<bundles_post_ra>
// kernel: tpu_custom_call.1
= control target key start
LH: loop header
LB: loop body
LE: loop exit
PB: predicated region body
PF: predicated region fallthrough
CT: control target
= control target key end

     0   :  { %s2295_s0 = inlined_call_operand.hbm [shape: bf16[256,256], index: 0, kind: input, shape index: {}]   ;;  %s2296_s1 = inlined_call_operand.hbm [shape: bf16[256,128], index: 1, kind: input, shape index: {}]   ;;  %s2297_s2 = inlined_call_operand.hbm [shape: bf16[128,128], index: 2, kind: input, shape index: {}]   ;;  %s2298_s3 = inlined_call_operand.vmem [shape: f32[1,128], index: 3, kind: input, shape index: {}]   ;;  %s2299_s4 = inlined_call_operand.vmem [shape: bf16[8,256], index: 4, kind: input, shape index: {}]   ;;  %s2300_s5 = inlined_call_operand.hbm [shape: bf16[128,128], index: 5, kind: input, shape index: {}]   ;;  %s2301_s6 = inlined_call_operand.vmem [shape: f32[1,128], index: 6, kind: input, shape index: {}]   ;;  %s2302_s7 = inlined_call_operand.hbm [shape: f32[8,128], index: 7, kind: output, shape index: {}]  }
   0x1   :  { %2316 = sst [smem:[#allocation20_spill]] %s2297_s2 }
   0x2   :  { %2317 = sst [smem:[#allocation21_spill]] %s2298_s3 }
   0x3   :  { %2318 = sst [smem:[#allocation22_spill]] %s2299_s4 }
   0x4   :  { %2319 = sst [smem:[#allocation23_spill]] %s2300_s5 }
   0x5   :  { %2320 = sst [smem:[#allocation24_spill]] %s2301_s6 }
   0x6   :  { %2321 = sst [smem:[#allocation25_spill]] %s2302_s7 }
   0x7   :  { %12 = vsyncpa [#allocation5], 0 }
   0x8   :  { %14 = vsyncpa [#allocation5 + $0x1], 0 }
   0x9   :  { %15 = vsyncpa [#allocation8], 0 }
   0xa   :  { %17 = vsyncpa [#allocation8 + $0x1], 0 }
   0xb   :  { %18 = vsyncpa [#allocation11], 0 }
   0xc   :  { %19 = vsyncpa [#allocation6], 0  ;;  %s1900_s24 = smov 0   ;;  %s1902_s25 = smov 0  }
   0xd   :  { %s1904_s26 = smov 0   ;;  %s1906_s27 = smov 0  }
   0xe   :  { %s1908_s28 = smov 0   ;;  %s1910_s29 = smov 0  }
   0xf   :  { %s1912_s30 = smov 0   ;;  %s1914_s8 = smov 0  }
  0x10   :  { %s1916_s9 = smov 0   ;;  %s1918_s10 = smov 0  }
  0x11   :  { %s1920_s11 = smov 0  }
  0x12 LB: > { %2322 = sst [smem:[#allocation18_spill]] %s1828_s30  ;;  %s1952_s12 = sadd.s32 4294967295, %s1844_s11   ;;  %s1844_s11 = sphi %s1920_s11, %s25_s11   ;;  %s1840_s10 = sphi %s1918_s10, %s2363_s10   ;;  %s1836_s9 = sphi %s1916_s9, %s2362_s9   ;;  %s1832_s8 = sphi %s1914_s8, %s2361_s8   ;;  %s1828_s30 = sphi %s1912_s30, %s2360_s30   ;;  %s1824_s29 = sphi %s1910_s29, %s2359_s29   ;;  %s1820_s28 = sphi %s1908_s28, %s2358_s28   ;;  %s1816_s27 = sphi %s1906_s27, %s2357_s27   ;;  %s1812_s26 = sphi %s1904_s26, %s2356_s26   ;;  %s1808_s25 = sphi %s1902_s25, %s2355_s25   ;;  %s1804_s24 = sphi %s1900_s24, %s2354_s24  }
  0x13   : > { %p59_p0 = scmp.ne.s32.totalorder %s1820_s28, %s1816_s27  ;;  %p2304_p1 = scmp.eq.s32.totalorder %s1952_s12, 0 }
  0x14   : > { %p85_p2 = scmp.ne.s32.totalorder %s1808_s25, %s1804_s24  ;;  %p1198_p3 = scmp.ge.s32.totalorder %s1844_s11, 1 }
  0x15   : > { %p227_p4 = scmp.lt.s32.totalorder %s1844_s11, 5  ;;  %p1961_p5 = por %p2304_p1, %p59_p0 }
  0x16   : > { %p1967_p6 = por %p85_p2, %p2304_p1  ;;  %s1846_s16 = smov [#allocation9]  }
  0x17   : > { %s2323_s13 = scalar_select %p1961_p5, 1, 0 }
  0x18   : > { %s2324_s14 = scalar_select %p1967_p6, 1, 0 }
  0x19   : > { %p1971_p7 = pnand %p1198_p3, %p227_p4  ;;  %s239_s17 = sshll.u32 %s1846_s16, 4  ;;  %s240_s17 = int_to_ptr.vmem [resolvable:$true] %s239_s17 }
  0x1a   : > { %s1847_s19 = smov [#allocation10]   ;;  %s2327_s2 = sld [smem:[#allocation20_spill]] }
  0x1b   : > { %s2325_s15 = scalar_select %p1971_p7, 1, 0 }
  0x1c   : > { %p1443_p8 = pneg %p1971_p7  ;;  %s255_s20 = sshll.u32 %s1847_s19, 4  ;;  %s256_s20 = int_to_ptr.vmem [resolvable:$true] %s255_s20 }
  0x1e   : > { %p1979_p9 = pnand %p1443_p8, %p2304_p1 }
  0x20   : > { %s1596_s23 = scalar_lea.hbm %s2327_s2, 1024  ;;  %p1598_p11 = pneg %p1979_p9 }
  0x21   : > { %p1597_p10 = scmp.ne.s32.totalorder %s2327_s2, %s1596_s23  ;;  %p1603_p0 = scmp.lt.u32.totalorder %s1596_s23, %s2327_s2 }
  0x23   : > { %p1599_p12 = pnand %p1598_p11, %p1597_p10 }
  0x25   : > { %p1600_p13 = pneg %p1599_p12 }
  0x27   : > { %p1605_p2 = pnand %p1603_p0, %p1600_p13 }
  0x29   : > { %1608 = shalt.err (!%p1605_p2)
}
  0x2a   : > { %s1609_s19 = scalar_lea.vmem %s240_s17, 1024  ;;  %p1617_p1 = scmp.lt.s32.totalorder %s240_s17, %s240_s17 }
  0x2b   : > { %p1610_p3 = scmp.ne.s32.totalorder %s240_s17, %s1609_s19  ;;  %p1618_p6 = scmp.lt.s32.totalorder %s1609_s19, %s1609_s19 }
  0x2d   : > { %p1612_p4 = pnand %p1610_p3, %p1598_p11  ;;  %p1619_p5 = por %p1618_p6, %p1617_p1 }
  0x2f   : > { %p1613_p8 = pneg %p1612_p4 }
  0x31   : > { %p1620_p7 = pnand %p1619_p5, %p1613_p8 }
  0x33   : > { %1623 = shalt.err (!%p1620_p7)
}
  0x34   : > { %s2308_s21 = smov 64   ;;  %s2310_s22 = smov 4  }
  0x35   : > { %1446 = dma.hbm_to_vmem [thread:$0]  (!%p1979_p9), %s2327_s2, 1024, %s240_s17, [#allocation8], %s2308_s21, %s2308_s21, %s2310_s22  }
  0x36   : > { %s2328_s5 = sld [smem:[#allocation23_spill]] }
  0x3c   : > { %s1624_s16 = scalar_lea.hbm %s2328_s5, 1024 }
  0x3d   : > { %p1625_p1 = scmp.ne.s32.totalorder %s2328_s5, %s1624_s16  ;;  %p1631_p7 = scmp.lt.u32.totalorder %s1624_s16, %s2328_s5 }
  0x3f   : > { %p1627_p5 = pnand %p1625_p1, %p1598_p11 }
  0x41   : > { %p1628_p6 = pneg %p1627_p5 }
  0x43   : > { %p1633_p10 = pnand %p1631_p7, %p1628_p6 }
  0x45   : > { %1636 = shalt.err (!%p1633_p10)
}
  0x46   : > { %s1637_s17 = scalar_lea.vmem %s256_s20, 1024  ;;  %p1645_p2 = scmp.lt.s32.totalorder %s256_s20, %s256_s20 }
  0x47   : > { %p1638_p12 = scmp.ne.s32.totalorder %s256_s20, %s1637_s17  ;;  %p1646_p3 = scmp.lt.s32.totalorder %s1637_s17, %s1637_s17 }
  0x49   : > { %p1640_p13 = pnand %p1638_p12, %p1598_p11  ;;  %p1647_p4 = por %p1646_p3, %p1645_p2 }
  0x4b   : > { %p1641_p0 = pneg %p1640_p13 }
  0x4d   : > { %p1648_p8 = pnand %p1647_p4, %p1641_p0 }
  0x4f   : > { %1651 = shalt.err (!%p1648_p8)
}
  0x50   : > { %1449 = dma.hbm_to_vmem [thread:$0]  (!%p1979_p9), %s2328_s5, 1024, %s256_s20, [#allocation11], %s2308_s21, %s2308_s21, %s2310_s22  }
  0x51   : > { %s34_s6 = sadd.s32 1, %s1836_s9  ;;  %s37_s18 = sadd.s32 1, %s1840_s10 }
  0x52   : > { %p35_p11 = scmp.ge.s32.totalorder %s34_s6, 2  ;;  %s46_s7 = sadd.s32 1, %s1824_s29 }
  0x53   : > { %p53_p1 = scmp.ne.s32.totalorder %s1824_s29, %s1820_s28  ;;  %p2315_p5 = scmp.eq.s32.totalorder %s1844_s11, 0 }
  0x54   : > { %s2365_s6 = smov (%p35_p11, %s34_s6), 0  ;;  %s2367_s18 = smov (!%p35_p11, %s37_s18), %s1840_s10 }
  0x55   : > { %2329 = sst [smem:[#allocation19_spill]] %s2365_s6  ;;  %s2042_s23 = ssub.s32 %s1836_s9, %s2365_s6 }
  0x56   : > { %p2046_p9 = por %p2315_p5, %p53_p1  ;;  %p39_p6 = scmp.ge.s32.totalorder %s2367_s18, 2 }
  0x57   : > { %p70_p7 = scmp.eq.s32.totalorder %s2042_s23, 0  ;;  %p2314_p10 = scmp.lt.s32.totalorder %s1844_s11, 4 }
  0x58   : > { %s272_s24 = sand.u32 1, %s1824_s29   ;;  %s2369_s18 = smov (%p39_p6, %s2367_s18), 0 }
  0x59   : > { %s1202_s27 = sshll.u32 %s272_s24, 6  ;;  %s41_s16 = ssub.s32 %s1840_s10, %s2369_s18 }
  0x5a   : > { %s43_s19 = sor.u32 %s2042_s23, %s41_s16  ;;  %s1255_s17 = sshll.u32 %s1840_s10, 5 }
  0x5b   : > { %p44_p12 = scmp.eq.s32.totalorder %s43_s19, 0  ;;  %s282_s3 = sadd.s32 %s1836_s9, %s1255_s17 }
  0x5c   : > { %s1205_s4 = sshll.u32 %s282_s3, 6  ;;  %s276_s21 = scalar_lea.vmem [#allocation4], %s1202_s27 }
  0x5d   : > { %s285_s22 = sshll.u32 %s276_s21, 4  ;;  %s2066_s30 = scalar_lea.hbm %s2295_s0, %s1205_s4  ;;  %s2068_s22 = int_to_ptr.vmem [resolvable:$true] %s285_s22 }
  0x5e   : > { %s2061_s2 = scalar_select %p44_p12, %s1824_s29, %s46_s7  }
  0x5f   : > { %p2074_p13 = pnand %p2314_p10, %p2046_p9  ;;  %s2079_s7 = scalar_lea.sflag [#allocation5], %s272_s24 }
  0x60   : > { %s1652_s5 = scalar_lea.hbm %s2066_s30, 1024  ;;  %s1657_s27 = scalar_lea.hbm %s2295_s0, 4096 }
  0x61   : > { %p1653_p0 = scmp.ne.s32.totalorder %s2066_s30, %s1652_s5  ;;  %p1654_p2 = pneg %p2074_p13 }
  0x62   : > { %p1658_p8 = scmp.lt.u32.totalorder %s2066_s30, %s2295_s0  ;;  %p1659_p11 = scmp.lt.u32.totalorder %s1657_s27, %s1652_s5 }
  0x63   : > { %p1655_p3 = pnand %p1654_p2, %p1653_p0  ;;  %p1661_p9 = scmp.lt.u32.totalorder %s1652_s5, %s2066_s30 }
  0x64   : > { %p1660_p1 = por %p1659_p11, %p1658_p8 }
  0x65   : > { %p1656_p4 = pneg %p1655_p3 }
  0x66   : > { %p1662_p6 = por %p1661_p9, %p1660_p1 }
  0x68   : > { %p1663_p12 = pnand %p1662_p6, %p1656_p4 }
  0x6a   : > { %1666 = shalt.err (!%p1663_p12)
}
  0x6b   : > { %s1667_s24 = scalar_lea.vmem %s2068_s22, 1024  ;;  %s1850_s3 = smov [#allocation4]  }
  0x6c   : > { %p1668_p0 = scmp.ne.s32.totalorder %s2068_s22, %s1667_s24  ;;  %s1672_s4 = sshll.u32 %s1850_s3, 4  ;;  %s1673_s4 = int_to_ptr.vmem [resolvable:$false] %s1672_s4 }
  0x6d   : > { %s1674_s6 = scalar_lea.vmem %s1673_s4, 2048  ;;  %p1675_p5 = scmp.lt.s32.totalorder %s2068_s22, %s1673_s4 }
  0x6e   : > { %p1670_p3 = pnand %p1668_p0, %p1654_p2  ;;  %p1676_p8 = scmp.lt.s32.totalorder %s1674_s6, %s1667_s24 }
  0x70   : > { %p1671_p10 = pneg %p1670_p3  ;;  %p1677_p11 = por %p1676_p8, %p1675_p5 }
  0x72   : > { %p1678_p1 = pnand %p1677_p11, %p1671_p10 }
  0x74   : > { %1681 = shalt.err (!%p1678_p1)
}
  0x75   : > { %s1851_s5 = smov 128   ;;  %s2332_s20 = smov 4  }
  0x76   : > { %s2333_s27 = smov 64   ;;  %s72_s19 = sadd.s32 1, %s1812_s26 }
  0x77   : > { %1453 = dma.hbm_to_vmem [thread:$0]  (!%p2074_p13), %s2066_s30, 1024, %s2068_s22, %s2079_s7, %s1851_s5, %s2333_s27, %s2332_s20  }
  0x78   : > { %p79_p5 = scmp.ne.s32.totalorder %s1812_s26, %s1808_s25  ;;  %p2334_p10 = scmp.eq.s32.totalorder %s1844_s11, 0 }
  0x79   : > { %s2115_s16 = scalar_select %p70_p7, %s1812_s26, %s72_s19  }
  0x7a   : > { %p81_p2 = por %p79_p5, %p2334_p10  ;;  %s297_s17 = sand.u32 1, %s1812_s26  }
  0x7b   : > { %s1256_s24 = sshll.u32 %s1836_s9, 10  ;;  %s1206_s3 = sshll.u32 %s297_s17, 6 }
  0x7c   : > { %s2124_s21 = scalar_lea.hbm %s2296_s1, %s1256_s24  ;;  %p2335_p4 = scmp.lt.s32.totalorder %s1844_s11, 4 }
  0x7d   : > { %s299_s22 = scalar_lea.vmem [#allocation7], %s1206_s3  ;;  %s2337_s7 = sand.u32 1, %s1844_s11  }
  0x7e   : > { %p2128_p13 = pnand %p2335_p4, %p81_p2  ;;  %s306_s23 = sshll.u32 %s299_s22, 4  ;;  %s2132_s23 = int_to_ptr.vmem [resolvable:$true] %s306_s23 }
  0x7f   : > { %s2136_s5 = scalar_lea.sflag [#allocation8], %s2337_s7  ;;  %s1682_s19 = scalar_lea.hbm %s2124_s21, 1024 }
  0x80   : > { %p1683_p7 = scmp.ne.s32.totalorder %s2124_s21, %s1682_s19  ;;  %p1684_p9 = pneg %p2128_p13 }
  0x81   : > { %s1687_s4 = scalar_lea.hbm %s2296_s1, 2048  ;;  %p1688_p0 = scmp.lt.u32.totalorder %s2124_s21, %s2296_s1 }
  0x82   : > { %p1685_p6 = pnand %p1684_p9, %p1683_p7  ;;  %p1689_p3 = scmp.lt.u32.totalorder %s1687_s4, %s1682_s19 }
  0x83   : > { %p1691_p11 = scmp.lt.u32.totalorder %s1682_s19, %s2124_s21 }
  0x84   : > { %p1686_p12 = pneg %p1685_p6  ;;  %p1690_p8 = por %p1689_p3, %p1688_p0 }
  0x86   : > { %p1692_p1 = por %p1691_p11, %p1690_p8 }
  0x88   : > { %p1693_p5 = pnand %p1692_p1, %p1686_p12 }
  0x8a   : > { %1696 = shalt.err (!%p1693_p5)
}
  0x8b   : > { %s1697_s22 = scalar_lea.vmem %s2132_s23, 1024  ;;  %s1852_s7 = smov [#allocation7]  }
  0x8c   : > { %p1698_p10 = scmp.ne.s32.totalorder %s2132_s23, %s1697_s22  ;;  %s1702_s17 = sshll.u32 %s1852_s7, 4  ;;  %s1703_s17 = int_to_ptr.vmem [resolvable:$false] %s1702_s17 }
  0x8d   : > { %s1704_s24 = scalar_lea.vmem %s1703_s17, 2048  ;;  %p1705_p7 = scmp.lt.s32.totalorder %s2132_s23, %s1703_s17 }
  0x8e   : > { %p1700_p2 = pnand %p1698_p10, %p1684_p9  ;;  %p1706_p6 = scmp.lt.s32.totalorder %s1704_s24, %s1697_s22 }
  0x90   : > { %p1701_p4 = pneg %p1700_p2  ;;  %p1707_p0 = por %p1706_p6, %p1705_p7 }
  0x92   : > { %p1708_p3 = pnand %p1707_p0, %p1701_p4 }
  0x94   : > { %1711 = shalt.err (!%p1708_p3)
}
  0x95   : > { %1456 = dma.hbm_to_vmem [thread:$0]  (!%p2128_p13), %s2124_s21, 1024, %s2132_s23, %s2136_s5, %s2333_s27, %s2333_s27, %s2332_s20  }
  0x96   : > { %p2338_p9 = scmp.ne.s32.totalorder %s2325_s15, 0 }
  0x97   : > { %s327_s19 = sand.u32 (!%p2338_p9), 1, %s1820_s28   ;;  %p2339_p12 = scmp.ne.s32.totalorder (!%p2338_p9), %s2323_s13, 0 }
  0x98   : > { %325 = sbr.rel (%p2338_p9) target bundleno = 1214 (0x4be), region = 48  ;;  %s1210_s4 = sshll.u32 (!%p2338_p9), %s327_s19, 6 }
  0x99   : > { %s328_s6 = scalar_lea.sflag (!%p2338_p9), [#allocation5], %s327_s19  ;;  %s2170_s3 = scalar_lea.vmem (!%p2338_p9), [#allocation4], %s1210_s4 }
  0x9f   : > { %1783 = dma.done.wait (%p2339_p12), %s328_s6, 1024  }
  0xa0   : > { %1785 = vsyncadd (%p2339_p12), %s328_s6, 4294966272  ;;  %s336_s30 = sand.u32 1, %s1952_s12   ;;  %s338_s21 = sand.u32 1, %s1808_s25  }
  0xa1   : > { %s1211_s20 = sshll.u32 %s338_s21, 6  ;;  %s337_s15 = scalar_lea.sflag [#allocation8], %s336_s30 }
  0xa2   : > { %s2178_s27 = scalar_lea.vmem [#allocation7], %s1211_s20  ;;  %p2340_p13 = scmp.ne.s32.totalorder %s2324_s14, 0 }
  0xa4   : > { %1787 = dma.done.wait (%p2340_p13), %s337_s15, 1024  }
  0xa5   : > { %1789 = vsyncadd (%p2340_p13), %s337_s15, 4294966272  ;;  %p2341_p8 = scmp.eq.s32.totalorder %s1952_s12, 0 }
  0xa7   : > { %1791 = dma.done.wait (%p2341_p8), [#allocation8], 1024   ;;  %p2342_p11 = pmov %p2341_p8 }
  0xa8   : > { %p2343_p1 = pmov %p2341_p8 }
  0xa9   : > { %1793 = vsyncadd (%p2342_p11), [#allocation8], 4294966272 }
  0xaa   : > { %1795 = dma.done.wait (%p2343_p1), [#allocation11], 1024   ;;  %p2344_p5 = pmov %p2343_p1 }
  0xab   : > { %s2345_s13 = sld [smem:[#allocation18_spill]]  ;;  %p385_p10 = scmp.lt.s32.totalorder %s1832_s8, 1 }
  0xac   : > { %1797 = vsyncadd (%p2344_p5), [#allocation11], 4294966272  ;;  %p390_p2 = scmp.eq.s32.totalorder %s1832_s8, 0  ;;  %s2346_s7 = sld [smem:[#allocation22_spill]] }
  0xad   : > { %s386_s14 = scalar_select %p385_p10, %s1832_s8, 1 }
  0xaf   : > { %s1214_s23 = sshll.u32 %s386_s14, 2 }
  0xb1   : > { %p391_p4 = scmp.eq.s32.totalorder %s2345_s13, 0 }
  0xb2   : > { %s2199_s17 = scalar_lea.vmem %s2346_s7, %s1214_s23 }
  0xb3   : > { %p392_p7 = pnand %p391_p4, %p390_p2 }
  0xb4   : > { %v1853_v0 = vmov (!%p392_p7), 0.0  }
  0xb5   : > { %395 = sbr.rel (%p392_p7) target bundleno = 188 (0xbc), region = 68  ;;  %396 = vst [vmem:[#allocation3] sm:$0xff] (!%p392_p7), %v1853_v0 }
  0xbc PF: > { %s2347_s24 = sld [smem:[#allocation18_spill]] }
  0xc2   : > { %p1215_p6 = scmp.ne.s32.totalorder %s2347_s24, 0 }
  0xc3   : > { %v1854_v1 = vmov (!%p1215_p6), 0.0  }
  0xc4   : > { %399 = sbr.rel (%p1215_p6) target bundleno = 204 (0xcc), region = 72  ;;  %400 = vst [vmem:[#allocation2] sm:$0xff] (!%p1215_p6), %v1854_v1  ;;  %401 = vst [vmem:[#allocation2 + $0x8] sm:$0xff] (!%p1215_p6), %v1854_v1 }
  0xc5   : > { %402 = vst [vmem:[#allocation2 + $0x10] sm:$0xff] (!%p1215_p6), %v1854_v1  ;;  %403 = vst [vmem:[#allocation2 + $0x18] sm:$0xff] (!%p1215_p6), %v1854_v1 }
  0xc6   : > { %404 = vst [vmem:[#allocation2 + $0x20] sm:$0xff] (!%p1215_p6), %v1854_v1  ;;  %405 = vst [vmem:[#allocation2 + $0x28] sm:$0xff] (!%p1215_p6), %v1854_v1 }
  0xc7   : > { %406 = vst [vmem:[#allocation2 + $0x30] sm:$0xff] (!%p1215_p6), %v1854_v1  ;;  %407 = vst [vmem:[#allocation2 + $0x38] sm:$0xff] (!%p1215_p6), %v1854_v1 }
  0xc8   : > { %408 = vst [vmem:[#allocation2 + $0x40] sm:$0xff] (!%p1215_p6), %v1854_v1  ;;  %409 = vst [vmem:[#allocation2 + $0x48] sm:$0xff] (!%p1215_p6), %v1854_v1 }
  0xc9   : > { %410 = vst [vmem:[#allocation2 + $0x50] sm:$0xff] (!%p1215_p6), %v1854_v1  ;;  %411 = vst [vmem:[#allocation2 + $0x58] sm:$0xff] (!%p1215_p6), %v1854_v1 }
  0xca   : > { %412 = vst [vmem:[#allocation2 + $0x60] sm:$0xff] (!%p1215_p6), %v1854_v1  ;;  %413 = vst [vmem:[#allocation2 + $0x68] sm:$0xff] (!%p1215_p6), %v1854_v1 }
  0xcb   : > { %414 = vst [vmem:[#allocation2 + $0x70] sm:$0xff] %v1854_v1  ;;  %415 = vst [vmem:[#allocation2 + $0x78] sm:$0xff] %v1854_v1 }
  0xcc PF: > { %v1564_v2 = vld [vmem:[%s2178_s27] sm:$0xff]   ;;  %v1565_v3 = vld [vmem:[%s2178_s27 + $0x8] sm:$0xff]   ;;  %v1566_v4 = vld [vmem:[%s2178_s27 + $0x10] sm:$0xff]   ;;  %s2348_s19 = sld [smem:[#allocation18_spill]] }
  0xcd   : > { %1307 = vmatprep.subr.bf16.mxu0 %v1564_v2  ;;  %1411 = vmatprep.subr.bf16.mxu1 %v1564_v2  ;;  %v1567_v5 = vld [vmem:[%s2178_s27 + $0x18] sm:$0xff]   ;;  %v1572_v6 = vld [vmem:[%s2170_s3] sm:$0xff]   ;;  %v1569_v9 = vld [vmem:[%s2178_s27 + $0x28] sm:$0xff]  }
  0xce   : > { %1308 = vmatpush3.bf16.msra.mxu0 %v1564_v2  ;;  %1419 = vmatpush3.bf16.msra.mxu1 %v1564_v2  ;;  %v1573_v7 = vld [vmem:[%s2170_s3 + $0x20] sm:$0xff]   ;;  %v1570_v10 = vld [vmem:[%s2178_s27 + $0x30] sm:$0xff]   ;;  %v1571_v11 = vld [vmem:[%s2178_s27 + $0x38] sm:$0xff]  }
  0xcf   : > { %1309 = vmatprep.subr.bf16.mxu0 %v1565_v3  ;;  %1412 = vmatprep.subr.bf16.mxu1 %v1565_v3  ;;  %v1568_v8 = vld [vmem:[%s2178_s27 + $0x20] sm:$0xff]   ;;  %v1574_v12 = vld [vmem:[%s2170_s3 + $0x8] sm:$0xff]   ;;  %v1576_v14 = vld [vmem:[%s2170_s3 + $0x10] sm:$0xff]  }
  0xd0   : > { %1323 = vmatprep.mubr.bf16.mxu0 %v1572_v6  ;;  %1331 = vmatprep.mubr.bf16.mxu1 %v1573_v7  ;;  %v1575_v13 = vld [vmem:[%s2170_s3 + $0x28] sm:$0xff]   ;;  %v1577_v15 = vld [vmem:[%s2170_s3 + $0x30] sm:$0xff]   ;;  %v1578_v16 = vld [vmem:[%s2170_s3 + $0x18] sm:$0xff]  }
  0xd1   : > { %v1579_v17 = vld [vmem:[%s2170_s3 + $0x38] sm:$0xff]   ;;  %v418_v18 = vld [vmem:[#allocation2 + $0x10] sm:$0xff]  ;;  %v419_v24 = vld [vmem:[#allocation2 + $0x18] sm:$0xff] }
  0xd2   : > { %1310 = vmatpush3.bf16.msra.mxu0 %v1565_v3  ;;  %1420 = vmatpush3.bf16.msra.mxu1 %v1565_v3  ;;  %p689_p0 = scmp.eq.s32.totalorder %s2348_s19, 1  ;;  %v426_v19 = vld [vmem:[#allocation2 + $0x50] sm:$0xff]  ;;  %v416_v20 = vld [vmem:[#allocation2] sm:$0xff]  ;;  %v427_v25 = vld [vmem:[#allocation2 + $0x58] sm:$0xff]  ;;  %p1232_p3 = scmp.ne.s32.totalorder %s2348_s19, 1 }
  0xd3   : > { %1311 = vmatprep.subr.bf16.mxu0 %v1566_v4  ;;  %1413 = vmatprep.subr.bf16.mxu1 %v1566_v4  ;;  %v424_v21 = vld [vmem:[#allocation2 + $0x40] sm:$0xff]  ;;  %v417_v30 = vld [vmem:[#allocation2 + $0x8] sm:$0xff]  ;;  %v422_v42 = vld [vmem:[#allocation2 + $0x30] sm:$0xff]  ;;  %vm1856_vm0 = vmmov (!%p1232_p3), 0   ;;  %s2349_s3 = sld [smem:[#allocation21_spill]] (!%p1232_p3) }
  0xd4   : > { %v425_v31 = vld [vmem:[#allocation2 + $0x48] sm:$0xff]  ;;  %v430_v43 = vld [vmem:[#allocation2 + $0x70] sm:$0xff]  ;;  %v420_v44 = vld [vmem:[#allocation2 + $0x20] sm:$0xff] }
  0xd5   : > { %v428_v45 = vld [vmem:[#allocation2 + $0x60] sm:$0xff]  ;;  %v423_v48 = vld [vmem:[#allocation2 + $0x38] sm:$0xff]  ;;  %v421_v54 = vld [vmem:[#allocation2 + $0x28] sm:$0xff] }
  0xd6   : > { %1312 = vmatpush3.bf16.msra.mxu0 %v1566_v4  ;;  %1421 = vmatpush3.bf16.msra.mxu1 %v1566_v4  ;;  %v431_v49 = vld [vmem:[#allocation2 + $0x78] sm:$0xff]  ;;  %v429_v55 = vld [vmem:[#allocation2 + $0x68] sm:$0xff]  ;;  %v1581_v3 = vld [vmem:[#allocation9 + $0x8] sm:$0xff] (!%p1232_p3)  }
  0xd7   : > { %1313 = vmatprep.subr.bf16.mxu0 %v1567_v5  ;;  %1414 = vmatprep.subr.bf16.mxu1 %v1567_v5  ;;  %v1580_v2 = vld [vmem:[#allocation9] sm:$0xff] (!%p1232_p3)   ;;  %v1582_v4 = vld [vmem:[#allocation9 + $0x10] sm:$0xff] (!%p1232_p3)  }
  0xda   : > { %1314 = vmatpush3.bf16.msra.mxu0 %v1567_v5  ;;  %1422 = vmatpush3.bf16.msra.mxu1 %v1567_v5  ;;  %v1583_v5 = vld [vmem:[#allocation9 + $0x18] sm:$0xff] (!%p1232_p3)  }
  0xdb   : > { %1315 = vmatprep.subr.bf16.mxu0 %v1568_v8  ;;  %1415 = vmatprep.subr.bf16.mxu1 %v1568_v8 }
  0xde   : > { %1316 = vmatpush3.bf16.msra.mxu0 %v1568_v8  ;;  %1423 = vmatpush3.bf16.msra.mxu1 %v1568_v8 }
  0xdf   : > { %1317 = vmatprep.subr.bf16.mxu0 %v1569_v9  ;;  %1416 = vmatprep.subr.bf16.mxu1 %v1569_v9 }
  0xe2   : > { %1318 = vmatpush3.bf16.msra.mxu0 %v1569_v9  ;;  %1424 = vmatpush3.bf16.msra.mxu1 %v1569_v9  ;;  %v1584_v9 = vld [vmem:[#allocation9 + $0x20] sm:$0xff] (!%p1232_p3)  }
  0xe3   : > { %1319 = vmatprep.subr.bf16.mxu0 %v1570_v10  ;;  %1417 = vmatprep.subr.bf16.mxu1 %v1570_v10 }
  0xe6   : > { %1320 = vmatpush3.bf16.msra.mxu0 %v1570_v10  ;;  %1425 = vmatpush3.bf16.msra.mxu1 %v1570_v10  ;;  %v1585_v10 = vld [vmem:[#allocation9 + $0x28] sm:$0xff] (!%p1232_p3)  }
  0xe7   : > { %1321 = vmatprep.subr.bf16.mxu0 %v1571_v11  ;;  %1418 = vmatprep.subr.bf16.mxu1 %v1571_v11 }
  0xea   : > { %1322 = vmatpush3.bf16.msra.mxu0 %v1571_v11  ;;  %1426 = vmatpush3.bf16.msra.mxu1 %v1571_v11  ;;  %v1586_v11 = vld [vmem:[#allocation9 + $0x30] sm:$0xff] (!%p1232_p3)  }
  0xeb   : > { %1339 = vmatprep.subr.bf16.mxu0 (!%p1232_p3), %v1580_v2 }
  0xed   : > { %1324 = vmatmul.mubr.bf16.vlgmr.msra.gmra.mrb[0].mxu0 %v1574_v12  ;;  %1332 = vmatmul.mubr.bf16.vlgmr.msra.gmra.mrb[0].mxu1 %v1575_v13  ;;  %v1587_v12 = vld [vmem:[#allocation9 + $0x38] sm:$0xff] (!%p1232_p3)  }
  0xee   : > { %1327 = vmatprep.mubr.bf16.mxu0 %v1576_v14  ;;  %1335 = vmatprep.mubr.bf16.mxu1 %v1577_v15 }
  0xef   : > { %1340 = vmatpush3.bf16.msra.mxu0 (!%p1232_p3), %v1580_v2 }
  0xf0   : > { %1341 = vmatprep.subr.bf16.mxu0 (!%p1232_p3), %v1581_v3 }
  0xf3   : > { %1342 = vmatpush3.bf16.msra.mxu0 (!%p1232_p3), %v1581_v3 }
  0xf4   : > { %1343 = vmatprep.subr.bf16.mxu0 (!%p1232_p3), %v1582_v4 }
  0xf5   : > { %1328 = vmatmul.mubr.bf16.gmra.mrb[4].mxu0 %v1578_v16  ;;  %1336 = vmatmul.mubr.bf16.gmra.mrb[4].mxu1 %v1579_v17 }
  0xf7   : > { %1344 = vmatpush3.bf16.msra.mxu0 (!%p1232_p3), %v1582_v4 }
  0xf8   : > { %1345 = vmatprep.subr.bf16.mxu0 (!%p1232_p3), %v1583_v5 }
  0xfb   : > { %1346 = vmatpush3.bf16.msra.mxu0 (!%p1232_p3), %v1583_v5 }
  0xfc   : > { %1347 = vmatprep.subr.bf16.mxu0 (!%p1232_p3), %v1584_v9 }
  0xff   : > { %1348 = vmatpush3.bf16.msra.mxu0 (!%p1232_p3), %v1584_v9 }
 0x100   : > { %1349 = vmatprep.subr.bf16.mxu0 (!%p1232_p3), %v1585_v10 }
 0x103   : > { %1350 = vmatpush3.bf16.msra.mxu0 (!%p1232_p3), %v1585_v10 }
 0x104   : > { %1351 = vmatprep.subr.bf16.mxu0 (!%p1232_p3), %v1586_v11 }
 0x107   : > { %1352 = vmatpush3.bf16.msra.mxu0 (!%p1232_p3), %v1586_v11 }
 0x108   : > { %1353 = vmatprep.subr.bf16.mxu0 (!%p1232_p3), %v1587_v12 }
 0x10b   : > { %1354 = vmatpush3.bf16.msra.mxu0 (!%p1232_p3), %v1587_v12 }
 0x1c0   : > { %v1325_v22 = vpop.f32.mrb[0].mxu0  ;;  %v1333_v23 = vpop.f32.mrb[0].mxu1 }
 0x1c1   : > { %v659_v26 = vadd.f32 %v1325_v22, %v418_v18  ;;  %v667_v27 = vadd.f32 %v1333_v23, %v426_v19  ;;  %v594_v28 = vpop.f32.mrb[1].mxu0  ;;  %v626_v29 = vpop.f32.mrb[1].mxu1 }
 0x1c2   : > { %v657_v32 = vadd.f32 %v594_v28, %v416_v20  ;;  %v665_v33 = vadd.f32 %v626_v29, %v424_v21  ;;  %v1326_v34 = vpop.f32.mrb[2].mxu0  ;;  %v1334_v35 = vpop.f32.mrb[2].mxu1 }
 0x1c3   : > { %675 = vst [vmem:[#allocation2 + $0x10] sm:$0xff] %v659_v26  ;;  %683 = vst [vmem:[#allocation2 + $0x50] sm:$0xff] %v667_v27  ;;  %v660_v36 = vadd.f32 %v1326_v34, %v419_v24  ;;  %v668_v37 = vadd.f32 %v1334_v35, %v427_v25  ;;  %v597_v38 = vpop.f32.mrb[3].mxu0  ;;  %v629_v39 = vpop.f32.mrb[3].mxu1  ;;  %v1855_v34 = vmov (!%p1232_p3), 0.0  }
 0x1c4   : > { %673 = vst [vmem:[#allocation2] sm:$0xff] %v657_v32  ;;  %681 = vst [vmem:[#allocation2 + $0x40] sm:$0xff] %v665_v33  ;;  %v658_v40 = vadd.f32 %v597_v38, %v417_v30  ;;  %v666_v41 = vadd.f32 %v629_v39, %v425_v31  ;;  %1371 = vmatprep.subr.bf16.mxu1 (!%p1232_p3), %v1855_v34  ;;  %1387 = vmatprep.mubr.msk.bf16.mxu1 (!%p1232_p3), %vm1856_vm0, %v1855_v34  ;;  %v1233_v35 = vld [vmem:[%s2349_s3] ss:$0 sm:$0xff] (!%p1232_p3) }
 0x1c5   : > { %676 = vst [vmem:[#allocation2 + $0x18] sm:$0xff] %v660_v36  ;;  %684 = vst [vmem:[#allocation2 + $0x58] sm:$0xff] %v668_v37 }
 0x1c6   : > { %674 = vst [vmem:[#allocation2 + $0x8] sm:$0xff] %v658_v40  ;;  %682 = vst [vmem:[#allocation2 + $0x48] sm:$0xff] %v666_v41 }
 0x1c8   : > { %v1329_v46 = vpop.f32.mrb[4].mxu0  ;;  %v1337_v47 = vpop.f32.mrb[4].mxu1  ;;  %692 = sbr.rel (%p1232_p3) target bundleno = 932 (0x3a4), region = 76 }
 0x1c9   : > { %v663_v50 = vadd.f32 %v1329_v46, %v422_v42  ;;  %v671_v51 = vadd.f32 %v1337_v47, %v430_v43  ;;  %v610_v52 = vpop.f32.mrb[5].mxu0  ;;  %v642_v53 = vpop.f32.mrb[5].mxu1 }
 0x1ca   : > { %v661_v56 = vadd.f32 %v610_v52, %v420_v44  ;;  %v669_v57 = vadd.f32 %v642_v53, %v428_v45  ;;  %v1330_v58 = vpop.f32.mrb[6].mxu0  ;;  %v1338_v59 = vpop.f32.mrb[6].mxu1  ;;  %v695_v13 = vld [vmem:[#allocation2 + $0x10] sm:$0xff] (!%p1232_p3) }
 0x1cb   : > { %679 = vst [vmem:[#allocation2 + $0x30] sm:$0xff] %v663_v50  ;;  %687 = vst [vmem:[#allocation2 + $0x70] sm:$0xff] %v671_v51  ;;  %v664_v60 = vadd.f32 %v1330_v58, %v423_v48  ;;  %v672_v61 = vadd.f32 %v1338_v59, %v431_v49  ;;  %v613_v62 = vpop.f32.mrb[7].mxu0  ;;  %v645_v63 = vpop.f32.mrb[7].mxu1  ;;  %v693_v6 = vld [vmem:[#allocation2] sm:$0xff] (!%p1232_p3)  ;;  %v703_v25 = vld [vmem:[#allocation2 + $0x50] sm:$0xff] (!%p1232_p3) }
 0x1cc   : > { %677 = vst [vmem:[#allocation2 + $0x20] sm:$0xff] %v661_v56  ;;  %685 = vst [vmem:[#allocation2 + $0x60] sm:$0xff] %v669_v57  ;;  %v662_v0 = vadd.f32 %v613_v62, %v421_v54  ;;  %v670_v1 = vadd.f32 %v645_v63, %v429_v55  ;;  %v696_v14 = vld [vmem:[#allocation2 + $0x18] sm:$0xff] (!%p1232_p3)  ;;  %v701_v21 = vld [vmem:[#allocation2 + $0x40] sm:$0xff] (!%p1232_p3) }
 0x1cd   : > { %680 = vst [vmem:[#allocation2 + $0x38] sm:$0xff] %v664_v60  ;;  %688 = vst [vmem:[#allocation2 + $0x78] sm:$0xff] %v672_v61  ;;  %v694_v7 = vld [vmem:[#allocation2 + $0x8] sm:$0xff] (!%p1232_p3)  ;;  %v710_v17 = vpack.c.bf16 (!%p1232_p3), %v696_v14, %v695_v13  ;;  %v704_v26 = vld [vmem:[#allocation2 + $0x58] sm:$0xff] (!%p1232_p3) }
 0x1ce   : > { %678 = vst [vmem:[#allocation2 + $0x28] sm:$0xff] %v662_v0  ;;  %686 = vst [vmem:[#allocation2 + $0x68] sm:$0xff] %v670_v1  ;;  %v709_v8 = vpack.c.bf16 (!%p1232_p3), %v694_v7, %v693_v6  ;;  %v702_v22 = vld [vmem:[#allocation2 + $0x48] sm:$0xff] (!%p1232_p3)  ;;  %v714_v29 = vpack.c.bf16 (!%p1232_p3), %v704_v26, %v703_v25 }
 0x1cf   : > { %v713_v24 = vpack.c.bf16 %v702_v22, %v701_v21 }
 0x1d0   : > { %1355 = vmatprep.mubr.bf16.mxu0 %v709_v8 }
 0x1d1   : > { %1356 = vmatmul.mubr.bf16.vlgmr.msra.gmra.mrb[0].mxu0 %v710_v17 }
 0x1d2   : > { %v699_v19 = vld [vmem:[#allocation2 + $0x30] sm:$0xff] }
 0x1d3   : > { %v697_v15 = vld [vmem:[#allocation2 + $0x20] sm:$0xff]  ;;  %v707_v31 = vld [vmem:[#allocation2 + $0x70] sm:$0xff] }
 0x1d4   : > { %v700_v20 = vld [vmem:[#allocation2 + $0x38] sm:$0xff]  ;;  %v705_v27 = vld [vmem:[#allocation2 + $0x60] sm:$0xff] }
 0x1d5   : > { %v698_v16 = vld [vmem:[#allocation2 + $0x28] sm:$0xff]  ;;  %v712_v23 = vpack.c.bf16 %v700_v20, %v699_v19  ;;  %v708_v32 = vld [vmem:[#allocation2 + $0x78] sm:$0xff] }
 0x1d6   : > { %v711_v18 = vpack.c.bf16 %v698_v16, %v697_v15  ;;  %v706_v28 = vld [vmem:[#allocation2 + $0x68] sm:$0xff]  ;;  %v716_v33 = vpack.c.bf16 %v708_v32, %v707_v31 }
 0x1d7   : > { %v715_v30 = vpack.c.bf16 %v706_v28, %v705_v27  ;;  %v902_v28 = vld [vmem:[%s2199_s17] sm:$0xf] }
 0x1d8   : > { %1359 = vmatprep.mubr.bf16.mxu0 %v711_v18 }
 0x1d9   : > { %1360 = vmatmul.mubr.bf16.gmra.mrb[4].mxu0 %v712_v23 }
 0x1da   : > { %1363 = vmatprep.mubr.bf16.mxu0 %v713_v24 }
 0x1e1   : > { %1364 = vmatmul.mubr.bf16.gmra.mrb[8].mxu0 %v714_v29  ;;  %v901_v29 = vld [vmem:[#allocation3] sm:$0xff] }
 0x1e2   : > { %1367 = vmatprep.mubr.bf16.mxu0 %v715_v30 }
 0x1e9   : > { %1368 = vmatmul.mubr.bf16.gmra.mrb[12].mxu0 %v716_v33 }
 0x2a4   : > { %v1357_v36 = vpop.f32.mrb[0].mxu0 }
 0x2a5   : > { %v831_v37 = vadd.f32 %v1357_v36, %v1233_v35  ;;  %v822_v38 = vpop.f32.mrb[1].mxu0 }
 0x2a6   : > { %v823_v39 = vadd.f32 %v1233_v35, %v822_v38  ;;  %v1358_v40 = vpop.f32.mrb[2].mxu0 }
 0x2a7   : > { %v834_v41 = vadd.f32 %v1358_v40, %v1233_v35  ;;  %v825_v42 = vpop.f32.mrb[3].mxu0  ;;  %v887_v44 = vmax.f32 %v831_v37, 0.0 }
 0x2a8   : > { %v826_v43 = vadd.f32 %v1233_v35, %v825_v42  ;;  %v885_v46 = vmax.f32 %v823_v39, 0.0 }
 0x2a9   : > { %v888_v45 = vmax.f32 %v834_v41, 0.0 }
 0x2aa   : > { %v886_v47 = vmax.f32 %v826_v43, 0.0 }
 0x2ab   : > { %v904_v48 = vpack.c.bf16 %v888_v45, %v887_v44 }
 0x2ac   : > { %v1361_v49 = vpop.f32.mrb[4].mxu0  ;;  %v903_v50 = vpack.c.bf16 %v886_v47, %v885_v46 }
 0x2ad   : > { %v847_v51 = vadd.f32 %v1361_v49, %v1233_v35  ;;  %v838_v52 = vpop.f32.mrb[5].mxu0 }
 0x2ae   : > { %v839_v53 = vadd.f32 %v1233_v35, %v838_v52  ;;  %v1362_v54 = vpop.f32.mrb[6].mxu0  ;;  %1372 = vmatpush3.bf16.msra.mxu1 %v903_v50 }
 0x2af   : > { %v850_v55 = vadd.f32 %v1362_v54, %v1233_v35  ;;  %v841_v56 = vpop.f32.mrb[7].mxu0  ;;  %1373 = vmatprep.subr.bf16.mxu1 %v1855_v34  ;;  %v891_v58 = vmax.f32 %v847_v51, 0.0 }
 0x2b0   : > { %v842_v57 = vadd.f32 %v1233_v35, %v841_v56  ;;  %v889_v60 = vmax.f32 %v839_v53, 0.0 }
 0x2b1   : > { %v892_v59 = vmax.f32 %v850_v55, 0.0 }
 0x2b2   : > { %v890_v61 = vmax.f32 %v842_v57, 0.0  ;;  %1374 = vmatpush3.bf16.msra.mxu1 %v904_v48 }
 0x2b3   : > { %v906_v62 = vpack.c.bf16 %v892_v59, %v891_v58  ;;  %1375 = vmatprep.subr.bf16.mxu1 %v1855_v34 }
 0x2b4   : > { %v905_v63 = vpack.c.bf16 %v890_v61, %v889_v60  ;;  %v1365_v0 = vpop.f32.mrb[8].mxu0 }
 0x2b5   : > { %v863_v1 = vadd.f32 %v1365_v0, %v1233_v35  ;;  %v854_v2 = vpop.f32.mrb[9].mxu0 }
 0x2b6   : > { %v855_v3 = vadd.f32 %v1233_v35, %v854_v2  ;;  %v1366_v4 = vpop.f32.mrb[10].mxu0  ;;  %1376 = vmatpush3.bf16.msra.mxu1 %v905_v63 }
 0x2b7   : > { %v866_v5 = vadd.f32 %v1366_v4, %v1233_v35  ;;  %v857_v6 = vpop.f32.mrb[11].mxu0  ;;  %1377 = vmatprep.subr.bf16.mxu1 %v1855_v34  ;;  %v895_v8 = vmax.f32 %v863_v1, 0.0 }
 0x2b8   : > { %v858_v7 = vadd.f32 %v1233_v35, %v857_v6  ;;  %v893_v10 = vmax.f32 %v855_v3, 0.0 }
 0x2b9   : > { %v896_v9 = vmax.f32 %v866_v5, 0.0 }
 0x2ba   : > { %v894_v11 = vmax.f32 %v858_v7, 0.0  ;;  %1378 = vmatpush3.bf16.msra.mxu1 %v906_v62 }
 0x2bb   : > { %v908_v12 = vpack.c.bf16 %v896_v9, %v895_v8  ;;  %1379 = vmatprep.subr.bf16.mxu1 %v1855_v34 }
 0x2bc   : > { %v907_v13 = vpack.c.bf16 %v894_v11, %v893_v10  ;;  %v1369_v14 = vpop.f32.mrb[12].mxu0 }
 0x2bd   : > { %v879_v15 = vadd.f32 %v1369_v14, %v1233_v35  ;;  %v870_v16 = vpop.f32.mrb[13].mxu0 }
 0x2be   : > { %v871_v17 = vadd.f32 %v1233_v35, %v870_v16  ;;  %v1370_v18 = vpop.f32.mrb[14].mxu0  ;;  %1380 = vmatpush3.bf16.msra.mxu1 %v907_v13 }
 0x2bf   : > { %v882_v19 = vadd.f32 %v1370_v18, %v1233_v35  ;;  %v873_v20 = vpop.f32.mrb[15].mxu0  ;;  %1381 = vmatprep.subr.bf16.mxu1 %v1855_v34  ;;  %v899_v22 = vmax.f32 %v879_v15, 0.0 }
 0x2c0   : > { %v874_v21 = vadd.f32 %v1233_v35, %v873_v20  ;;  %v897_v24 = vmax.f32 %v871_v17, 0.0 }
 0x2c1   : > { %v900_v23 = vmax.f32 %v882_v19, 0.0 }
 0x2c2   : > { %v898_v25 = vmax.f32 %v874_v21, 0.0  ;;  %1382 = vmatpush3.bf16.msra.mxu1 %v908_v12 }
 0x2c3   : > { %v910_v26 = vpack.c.bf16 %v900_v23, %v899_v22  ;;  %1383 = vmatprep.subr.bf16.mxu1 %v1855_v34 }
 0x2c4   : > { %v909_v27 = vpack.c.bf16 %v898_v25, %v897_v24 }
 0x2c6   : > { %1384 = vmatpush3.bf16.msra.mxu1 %v909_v27 }
 0x2c7   : > { %1385 = vmatprep.subr.bf16.mxu1 %v1855_v34 }
 0x2ca   : > { %1386 = vmatpush3.bf16.msra.mxu1 %v910_v26 }
 0x2cd   : > { %1388 = vmatmul.mubr.bf16.vlgmr.msra.gmra.mrb[0].mxu1 %v902_v28 }
 0x3a0   : > { %v945_v30 = vpop.f32.mrb[0].mxu1 }
 0x3a1   : > { %v951_v31 = vadd.f32 %v945_v30, %v901_v29  ;;  %v1389_v32 = vpop.f32.mrb[1].mxu1 }
 0x3a2   : > { %v948_v33 = vpop.f32.mrb[2].mxu1 }
 0x3a3   : > { %952 = vst [vmem:[#allocation3] sm:$0xff] %v951_v31  ;;  %v1390_v35 = vpop.f32.mrb[3].mxu1 }
 0x3a4 PF: > { %p953_p9 = scmp.eq.s32.totalorder %s1832_s8, 1 }
 0x3a6   : > { %p954_p12 = pnand %p953_p9, %p689_p0 }
 0x3a7   : > { %v1588_v36 = vld [vmem:[#allocation10] sm:$0xff] (!%p954_p12)   ;;  %v1857_v37 = vmov (!%p954_p12), 0.0   ;;  %v1589_v34 = vld [vmem:[#allocation10 + $0x8] sm:$0xff] (!%p954_p12)   ;;  %vm1858_vm1 = vmmov (!%p954_p12), 0   ;;  %v1590_v38 = vld [vmem:[#allocation10 + $0x10] sm:$0xff] (!%p954_p12)   ;;  %s2351_s20 = sld [smem:[#allocation24_spill]] (!%p954_p12) }
 0x3a8   : > { %957 = sbr.rel (%p954_p12) target bundleno = 1183 (0x49f), region = 80  ;;  %1391 = vmatprep.subr.bf16.mxu0 (!%p954_p12), %v1857_v37  ;;  %1407 = vmatprep.mubr.msk.bf16.mxu0 (!%p954_p12), %vm1858_vm1, %v1857_v37  ;;  %v1591_v39 = vld [vmem:[#allocation10 + $0x18] sm:$0xff] (!%p954_p12)   ;;  %v1592_v40 = vld [vmem:[#allocation10 + $0x20] sm:$0xff] (!%p954_p12)   ;;  %v1593_v41 = vld [vmem:[#allocation10 + $0x28] sm:$0xff] (!%p954_p12)  }
 0x3a9   : > { %1392 = vmatpush3.bf16.msra.mxu0 (!%p954_p12), %v1588_v36  ;;  %v1594_v42 = vld [vmem:[#allocation10 + $0x30] sm:$0xff] (!%p954_p12)   ;;  %v1595_v43 = vld [vmem:[#allocation10 + $0x38] sm:$0xff] (!%p954_p12)  }
 0x3aa   : > { %1393 = vmatprep.subr.bf16.mxu0 (!%p954_p12), %v1857_v37  ;;  %v958_v44 = vld [vmem:[#allocation3] sm:$0xff] (!%p954_p12) }
 0x3ab   : > { %v959_v45 = vpack.c.bf16 (!%p954_p12), %v958_v44, %v958_v44 }
 0x3ad   : > { %1394 = vmatpush3.bf16.msra.mxu0 (!%p954_p12), %v1589_v34  ;;  %v1242_v46 = vld [vmem:[%s2351_s20] ss:$0 sm:$0xff] (!%p954_p12) }
 0x3ae   : > { %1395 = vmatprep.subr.bf16.mxu0 (!%p954_p12), %v1857_v37 }
 0x3b1   : > { %1396 = vmatpush3.bf16.msra.mxu0 %v1590_v38 }
 0x3b2   : > { %1397 = vmatprep.subr.bf16.mxu0 %v1857_v37 }
 0x3b5   : > { %1398 = vmatpush3.bf16.msra.mxu0 %v1591_v39 }
 0x3b6   : > { %1399 = vmatprep.subr.bf16.mxu0 %v1857_v37 }
 0x3b9   : > { %1400 = vmatpush3.bf16.msra.mxu0 %v1592_v40 }
 0x3ba   : > { %1401 = vmatprep.subr.bf16.mxu0 %v1857_v37 }
 0x3bd   : > { %1402 = vmatpush3.bf16.msra.mxu0 %v1593_v41 }
 0x3be   : > { %1403 = vmatprep.subr.bf16.mxu0 %v1857_v37 }
 0x3c1   : > { %1404 = vmatpush3.bf16.msra.mxu0 %v1594_v42 }
 0x3c2   : > { %1405 = vmatprep.subr.bf16.mxu0 %v1857_v37 }
 0x3c5   : > { %1406 = vmatpush3.bf16.msra.mxu0 %v1595_v43 }
 0x3c8   : > { %1408 = vmatmul.mubr.bf16.vlgmr.msra.gmra.mrb[0].mxu0 %v959_v45 }
 0x49b   : > { %v1065_v47 = vpop.f32.mrb[0].mxu0 }
 0x49c   : > { %v1066_v48 = vadd.f32 %v1242_v46, %v1065_v47  ;;  %v1409_v49 = vpop.f32.mrb[1].mxu0 }
 0x49d   : > { %v1068_v50 = vpop.f32.mrb[2].mxu0 }
 0x49e   : > { %1071 = vst [vmem:[#allocation12] sm:$0xff] %v1066_v48  ;;  %v1410_v51 = vpop.f32.mrb[3].mxu0 }
 0x49f PF: > { %p1462_p13 = scmp.eq.s32.totalorder %s1952_s12, 3  ;;  %s1859_s15 = smov [#allocation12]  }
 0x4a0   : > { %s1079_s27 = sshll.u32 %s1859_s15, 4  ;;  %s1080_s27 = int_to_ptr.vmem [resolvable:$true] %s1079_s27 }
 0x4a1   : > { %s1712_s13 = scalar_lea.vmem %s1080_s27, 128  ;;  %p1719_p5 = scmp.lt.s32.totalorder %s1080_s27, %s1080_s27 }
 0x4a2   : > { %p1713_p8 = scmp.ne.s32.totalorder %s1080_s27, %s1712_s13  ;;  %p1720_p10 = scmp.lt.s32.totalorder %s1712_s13, %s1712_s13 }
 0x4a4   : > { %p1714_p11 = pnand %p1713_p8, %p1462_p13  ;;  %p1721_p2 = por %p1720_p10, %p1719_p5 }
 0x4a6   : > { %p1715_p1 = pneg %p1714_p11 }
 0x4a8   : > { %p1722_p4 = pnand %p1721_p2, %p1715_p1 }
 0x4aa   : > { %1725 = shalt.err (!%p1722_p4)
}
 0x4ab   : > { %s2352_s5 = sld [smem:[#allocation25_spill]] }
 0x4b1   : > { %s1726_s22 = scalar_lea.hbm %s2352_s5, 128 }
 0x4b2   : > { %p1727_p7 = scmp.ne.s32.totalorder %s2352_s5, %s1726_s22  ;;  %p1732_p3 = scmp.lt.u32.totalorder %s1726_s22, %s2352_s5 }
 0x4b4   : > { %p1728_p6 = pnand %p1727_p7, %p1462_p13 }
 0x4b6   : > { %p1729_p0 = pneg %p1728_p6 }
 0x4b8   : > { %p1734_p9 = pnand %p1732_p3, %p1729_p0 }
 0x4ba   : > { %1737 = shalt.err (!%p1734_p9)
}
 0x4bb   : > { %1440 = dma.vmem_to_hbm [thread:$0]  (%p1462_p13), %s1080_s27, 128, %s2352_s5, [#allocation6]  }
 0x4bc   : > { %1799 = dma.done.wait (%p1462_p13), [#allocation6], 128  }
 0x4bd   : > { %1801 = vsyncadd (%p1462_p13), [#allocation6], 4294967168 }
 0x4be PF: > { %s25_s11 = sadd.s32 1, %s1844_s11   ;;  %s2353_s3 = sld [smem:[#allocation19_spill]] }
 0x4bf   : > { %p22_p12 = scmp.ge.s32.totalorder %s25_s11, 6   ;;  %s2354_s24 = smov %s1808_s25 }
 0x4c0   : > { %s2355_s25 = smov %s1812_s26  ;;  %s2356_s26 = smov %s2115_s16 }
 0x4c1   : > { %s2357_s27 = smov %s1820_s28  ;;  %s2358_s28 = smov %s1824_s29 }
 0x4c2   : > { %s2359_s29 = smov %s2061_s2  ;;  %s2360_s30 = smov %s1836_s9 }
 0x4c3   : > { %s2361_s8 = smov %s1840_s10  ;;  %s2363_s10 = smov %s2369_s18 }
 0x4c4   : > { %s2362_s9 = smov %s2353_s3  ;;  %24 = sbr.rel (!%p22_p12) target bundleno = 18 (0x12), region = 125 }
 0x4cb   :  { %1092 = vsyncpa [#allocation5], 1 }
 0x4cc   :  { %1094 = vsyncpa [#allocation5 + $0x1], 1 }
 0x4cd   :  { %1095 = vsyncpa [#allocation8], 1 }
 0x4ce   :  { %1097 = vsyncpa [#allocation8 + $0x1], 1 }
 0x4cf   :  { %1098 = vsyncpa [#allocation11], 1 }
 0x4d0   :  { %1099 = vsyncpa [#allocation6], 1 }
 0x4d1   :  { %1101 = vsyncpa [#allocation6 + $0x1], 1 }

</bundles_post_ra>
